<compile_context>
chip_gen: v7x
topology: tpu7x:2x2x1
jax: 0.10.0
libtpu: 0.0.40
codegen_flags: <defaults>
</compile_context>

<pallas_src>
import functools

import jax
import jax.numpy as jnp
from jax import lax
from jax.experimental import pallas as pl
from jax.experimental.pallas import tpu as pltpu

EPS = 1e-5        # InstanceNorm2d / AdaIN eps
SLOPE = 0.2       # LeakyReLU negative slope

# Worst-case live blocks (final 2x upsample layer) ~= 28 MiB; 48 MiB leaves
# headroom and still fits v7x's 64 MiB physical VMEM.
VMEM_LIMIT_BYTES = 48 * 1024 * 1024


def _lrelu(y):
    return jnp.where(y >= 0.0, y, SLOPE * y)


def _compiler_params(dim_semantics):
    return pltpu.CompilerParams(
        dimension_semantics=dim_semantics,
        vmem_limit_bytes=VMEM_LIMIT_BYTES)


# ---------------------------------------------------------------------------
# fc: Linear + LeakyReLU (tiny, single block)
# ---------------------------------------------------------------------------

def _fc_kernel(x_ref, w_ref, b_ref, o_ref):
    y = jnp.dot(x_ref[...], w_ref[...], preferred_element_type=jnp.float32)
    o_ref[...] = _lrelu(y + b_ref[...])


def fc_lrelu(x, w, b):
    B, K = x.shape
    M = w.shape[1]
    return pl.pallas_call(
        _fc_kernel,
        out_shape=jax.ShapeDtypeStruct((B, M), jnp.float32),
        grid=(1,),
        in_specs=[pl.BlockSpec((B, K), lambda i: (0, 0)),
                  pl.BlockSpec((K, M), lambda i: (0, 0)),
                  pl.BlockSpec((1, M), lambda i: (0, 0))],
        out_specs=pl.BlockSpec((B, M), lambda i: (0, 0)),
        compiler_params=_compiler_params(("arbitrary",)),
    )(x, w, b.reshape(1, M))


# ---------------------------------------------------------------------------
# Fused conv3x3 + bias + instance/ada-norm + LeakyReLU (+ residual) kernel.
# Activations are NCHW with a 1-pixel zero halo: (B, C, H+2, W+2).
# Grid = (B,) ("parallel"); the whole image stays resident in VMEM.
# ---------------------------------------------------------------------------

def _conv_block_kernel(x_ref, w_ref, b_ref, g_ref, bt_ref, *rest,
                       H, W, cin, cout, residual):
    if residual:
        res_ref, o_ref = rest
    else:
        (o_ref,) = rest
    bidx = pl.program_id(0)
    Hp, Wp = H + 2, W + 2

    # Zero the 1-pixel halo of the output block (the next conv reads it as pad).
    zrow = jnp.zeros((1, cout, 1, Wp), jnp.float32)
    o_ref[:, :, 0:1, :] = zrow
    o_ref[:, :, Hp - 1:Hp, :] = zrow
    zcol = jnp.zeros((1, cout, Hp, 1), jnp.float32)
    o_ref[:, :, :, 0:1] = zcol
    o_ref[:, :, :, Wp - 1:Wp] = zcol

    def out_channel(co, carry):
        def in_channel(ci, acc):
            # 9 shifted slab MACs: conv without any im2col materialization.
            for dy in range(3):
                for dx in range(3):
                    wv = w_ref[((dy * 3 + dx) * cin + ci) * cout + co]
                    acc = acc + wv * x_ref[0, ci, dy:dy + H, dx:dx + W]
            return acc

        acc = jnp.full((H, W), b_ref[co], jnp.float32)
        acc = lax.fori_loop(0, cin, in_channel, acc)

        # Per-(batch, channel) instance norm over (H, W), biased variance.
        mean = jnp.mean(acc)
        d = acc - mean
        var = jnp.mean(d * d)
        y = d * lax.rsqrt(var + EPS)
        y = y * g_ref[bidx, co] + bt_ref[bidx, co]
        y = _lrelu(y)
        if residual:
            y = y + res_ref[0, co, 1:H + 1, 1:W + 1]
        o_ref[0, co, 1:H + 1, 1:W + 1] = y
        return carry

    lax.fori_loop(0, cout, out_channel, 0)


def conv3x3_block(x_pad, w, b, gamma, beta, res_pad=None):
    """x_pad: (B, Cin, H+2, W+2) zero-haloed NCHW.  Returns (B, Cout, H+2, W+2)."""
    B, cin, Hp, Wp = x_pad.shape
    H, W = Hp - 2, Wp - 2
    cout = w.shape[-1]
    residual = res_pad is not None
    kernel = functools.partial(_conv_block_kernel, H=H, W=W, cin=cin, cout=cout,
                               residual=residual)
    smem = pl.BlockSpec(memory_space=pltpu.MemorySpace.SMEM)
    in_specs = [pl.BlockSpec((1, cin, Hp, Wp), lambda bb: (bb, 0, 0, 0)),
                smem, smem, smem, smem]
    args = [x_pad, w.reshape(-1), b, gamma, beta]
    if residual:
        in_specs.append(pl.BlockSpec((1, cout, Hp, Wp), lambda bb: (bb, 0, 0, 0)))
        args.append(res_pad)
    # TODO(synk): for more v7x megacore parallelism, split each image into row
    # tiles (two-pass norm stats) instead of one grid point per batch element.
    return pl.pallas_call(
        kernel,
        out_shape=jax.ShapeDtypeStruct((B, cout, Hp, Wp), jnp.float32),
        grid=(B,),
        in_specs=in_specs,
        out_specs=pl.BlockSpec((1, cout, Hp, Wp), lambda bb: (bb, 0, 0, 0)),
        compiler_params=_compiler_params(("parallel",)),
    )(*args)


# ---------------------------------------------------------------------------
# Fused ConvTranspose2d(k=2, s=2) + bias + norm + LeakyReLU kernel.
# The 2x2 pixel scatter is done in-kernel with 0/1 scatter matmuls (MXU):
#   out = R0 @ (t00 @ S0 + t01 @ S1) + R1 @ (t10 @ S0 + t11 @ S1)
# ---------------------------------------------------------------------------

def _deconv_block_kernel(x_ref, w_ref, b_ref, g_ref, bt_ref, o_ref,
                         *, H, W, cin, cout):
    bidx = pl.program_id(0)
    H2, W2 = 2 * H, 2 * W
    Hp2, Wp2 = H2 + 2, W2 + 2

    # Zero the output halo.
    zrow = jnp.zeros((1, cout, 1, Wp2), jnp.float32)
    o_ref[:, :, 0:1, :] = zrow
    o_ref[:, :, Hp2 - 1:Hp2, :] = zrow
    zcol = jnp.zeros((1, cout, Hp2, 1), jnp.float32)
    o_ref[:, :, :, 0:1] = zcol
    o_ref[:, :, :, Wp2 - 1:Wp2] = zcol

    # Column scatter S_sx (W, 2W) and row scatter R_sy (2H, H).
    iw = lax.broadcasted_iota(jnp.int32, (W, W2), 0)
    ix = lax.broadcasted_iota(jnp.int32, (W, W2), 1)
    S0 = (ix == 2 * iw).astype(jnp.float32)
    S1 = (ix == 2 * iw + 1).astype(jnp.float32)
    iy = lax.broadcasted_iota(jnp.int32, (H2, H), 0)
    ih = lax.broadcasted_iota(jnp.int32, (H2, H), 1)
    R0 = (iy == 2 * ih).astype(jnp.float32)
    R1 = (iy == 2 * ih + 1).astype(jnp.float32)

    def out_channel(co, carry):
        def in_channel(ci, ts):
            t00, t01, t10, t11 = ts
            xs = x_ref[0, ci, 1:H + 1, 1:W + 1]
            base = (ci * cout + co) * 4
            t00 = t00 + w_ref[base + 0] * xs
            t01 = t01 + w_ref[base + 1] * xs
            t10 = t10 + w_ref[base + 2] * xs
            t11 = t11 + w_ref[base + 3] * xs
            return (t00, t01, t10, t11)

        bias = b_ref[co]
        init = tuple(jnp.full((H, W), bias, jnp.float32) for _ in range(4))
        t00, t01, t10, t11 = lax.fori_loop(0, cin, in_channel, init)

        u0 = (jnp.dot(t00, S0, preferred_element_type=jnp.float32)
              + jnp.dot(t01, S1, preferred_element_type=jnp.float32))
        u1 = (jnp.dot(t10, S0, preferred_element_type=jnp.float32)
              + jnp.dot(t11, S1, preferred_element_type=jnp.float32))
        pre = (jnp.dot(R0, u0, preferred_element_type=jnp.float32)
               + jnp.dot(R1, u1, preferred_element_type=jnp.float32))

        mean = jnp.mean(pre)
        d = pre - mean
        var = jnp.mean(d * d)
        y = d * lax.rsqrt(var + EPS)
        y = y * g_ref[bidx, co] + bt_ref[bidx, co]
        y = _lrelu(y)
        o_ref[0, co, 1:H2 + 1, 1:W2 + 1] = y
        return carry

    lax.fori_loop(0, cout, out_channel, 0)


def deconv2x2_block(x_pad, w, b, gamma, beta):
    """x_pad: (B, Cin, H+2, W+2).  Returns (B, Cout, 2H+2, 2W+2), zero-haloed."""
    B, cin, Hp, Wp = x_pad.shape
    H, W = Hp - 2, Wp - 2
    cout = w.shape[1]
    Hp2, Wp2 = 2 * H + 2, 2 * W + 2
    kernel = functools.partial(_deconv_block_kernel, H=H, W=W, cin=cin, cout=cout)
    smem = pl.BlockSpec(memory_space=pltpu.MemorySpace.SMEM)
    return pl.pallas_call(
        kernel,
        out_shape=jax.ShapeDtypeStruct((B, cout, Hp2, Wp2), jnp.float32),
        grid=(B,),
        in_specs=[pl.BlockSpec((1, cin, Hp, Wp), lambda bb: (bb, 0, 0, 0)),
                  smem, smem, smem, smem],
        out_specs=pl.BlockSpec((1, cout, Hp2, Wp2), lambda bb: (bb, 0, 0, 0)),
        compiler_params=_compiler_params(("parallel",)),
    )(x_pad, w.reshape(-1), b, gamma, beta)


# ---------------------------------------------------------------------------
# Fused 1x1 output conv + sigmoid (final nir/vis head).
# ---------------------------------------------------------------------------

def _out_conv_kernel(x_ref, w_ref, b_ref, o_ref, *, H, W, cin, cout):
    for co in range(cout):                      # cout == 3, unrolled
        acc = jnp.full((H, W), b_ref[co], jnp.float32)
        for ci in range(cin):
            acc = acc + w_ref[ci * cout + co] * x_ref[0, ci, 1:H + 1, 1:W + 1]
        o_ref[0, co] = 1.0 / (1.0 + jnp.exp(-acc))


def out_conv_sigmoid(x_pad, w, b):
    B, cin, Hp, Wp = x_pad.shape
    H, W = Hp - 2, Wp - 2
    cout = w.shape[1]
    kernel = functools.partial(_out_conv_kernel, H=H, W=W, cin=cin, cout=cout)
    smem = pl.BlockSpec(memory_space=pltpu.MemorySpace.SMEM)
    return pl.pallas_call(
        kernel,
        out_shape=jax.ShapeDtypeStruct((B, cout, H, W), jnp.float32),
        grid=(B,),
        in_specs=[pl.BlockSpec((1, cin, Hp, Wp), lambda bb: (bb, 0, 0, 0)),
                  smem, smem],
        out_specs=pl.BlockSpec((1, cout, H, W), lambda bb: (bb, 0, 0, 0)),
        compiler_params=_compiler_params(("parallel",)),
    )(x_pad, w.reshape(-1), b)


# ---------------------------------------------------------------------------
# Parameter init (deterministic, synthetic) + forward
# ---------------------------------------------------------------------------

def make_block(key, kind, cin, cout, norm, batch):
    k1, k2, k3, k4 = jax.random.split(key, 4)
    if kind == "deconv":
        w = 0.1 * jax.random.normal(k1, (cin, cout, 2, 2), jnp.float32)
    else:
        w = 0.1 * jax.random.normal(k1, (3, 3, cin, cout), jnp.float32)
    b = 0.05 * jax.random.normal(k2, (cout,), jnp.float32)
    if norm == "adain":
        # AdaIN weight/bias are per-(batch, channel), assigned externally in
        # the original code; initialized deterministically here.
        gamma = 1.0 + 0.1 * jax.random.normal(k3, (batch, cout), jnp.float32)
        beta = 0.1 * jax.random.normal(k4, (batch, cout), jnp.float32)
    else:  # InstanceNorm2d (affine=False)
        gamma = jnp.ones((batch, cout), jnp.float32)
        beta = jnp.zeros((batch, cout), jnp.float32)
    return {"kind": kind, "w": w, "b": b, "gamma": gamma, "beta": beta}


def init_decoder_params(key, ndf=8, output_dim=3, batch=2):
    c0, c1, c2 = 4 * ndf, 2 * ndf, ndf
    arch = [
        ("deconv", c0, c0, "in"), ("res", c0, c0, "in"),
        ("deconv", c0, c0, "in"), ("res", c0, c0, "in"),
        ("deconv", c0, c1, "in"), ("res", c1, c1, "in"),
        ("deconv", c1, c1, "in"), ("res", c1, c1, "in"),
        ("deconv", c1, c1, "in"), ("res", c1, c1, "in"),
        ("deconv", c1, c2, "adain"), ("res", c2, c2, "adain"),
        ("conv",   c2, c2, "adain"), ("res", c2, c2, "adain"),
        ("conv",   c2, c2, "adain"),
    ]
    ki = iter(jax.random.split(key, 128))
    params = {}
    params["fc_w"] = 0.1 * jax.random.normal(next(ki), (256, 4 * ndf * 16), jnp.float32)
    params["fc_b"] = 0.05 * jax.random.normal(next(ki), (4 * ndf * 16,), jnp.float32)
    layers = []
    for (kind, cin, cout, norm) in arch:
        if kind == "res":
            layers.append({"type": "res",
                           "blk1": make_block(next(ki), "conv", cin, cout, norm, batch),
                           "blk2": make_block(next(ki), "conv", cout, cout, norm, batch)})
        else:
            layers.append({"type": kind,
                           "blk": make_block(next(ki), kind, cin, cout, norm, batch)})
    params["layers"] = layers
    params["nir_w"] = 0.1 * jax.random.normal(next(ki), (c2, output_dim), jnp.float32)
    params["nir_b"] = 0.05 * jax.random.normal(next(ki), (output_dim,), jnp.float32)
    params["vis_w"] = 0.1 * jax.random.normal(next(ki), (c2, output_dim), jnp.float32)
    params["vis_b"] = 0.05 * jax.random.normal(next(ki), (output_dim,), jnp.float32)
    return params


def decoder_forward(params, x, modality="nir"):
    """x: (B, 256) -> (B, 3, 256, 256), matches PyTorch decoder.forward."""
    B = x.shape[0]
    ndf = params["fc_w"].shape[1] // 64          # fc out = 4*ndf*4*4
    # fc: Linear + LeakyReLU, then view(B, 4*ndf, 4, 4) (NCHW), add zero halo.
    h = fc_lrelu(x, params["fc_w"], params["fc_b"])
    h = h.reshape(B, 4 * ndf, 4, 4)
    h = jnp.pad(h, ((0, 0), (0, 0), (1, 1), (1, 1)))
    # conv stack (all activations carry a 1-pixel zero halo)
    for layer in params["layers"]:
        if layer["type"] == "res":
            b1, b2 = layer["blk1"], layer["blk2"]
            y = conv3x3_block(h, b1["w"], b1["b"], b1["gamma"], b1["beta"])
            # residual add folded into the second conv block's epilogue
            h = conv3x3_block(y, b2["w"], b2["b"], b2["gamma"], b2["beta"], res_pad=h)
        elif layer["type"] == "deconv":
            blk = layer["blk"]
            h = deconv2x2_block(h, blk["w"], blk["b"], blk["gamma"], blk["beta"])
        else:  # plain convblock
            blk = layer["blk"]
            h = conv3x3_block(h, blk["w"], blk["b"], blk["gamma"], blk["beta"])
    if modality == "nir":
        w, b = params["nir_w"], params["nir_b"]
    else:
        w, b = params["vis_w"], params["vis_b"]
    return out_conv_sigmoid(h, w, b)             # (B, 3, 256, 256) NCHW


if __name__ == "__main__":
    key = jax.random.PRNGKey(0)
    kp, kx = jax.random.split(key)
    B, ndf, out_dim = 2, 8, 3
    params = init_decoder_params(kp, ndf=ndf, output_dim=out_dim, batch=B)
    x = jax.random.normal(kx, (B, 256), jnp.float32)

    out = decoder_forward(params, x, modality="nir")
    out = jax.block_until_ready(out)

    assert out.shape == (B, out_dim, 256, 256), out.shape
    assert bool(jnp.isfinite(out).all())
    assert bool((out >= 0.0).all()) and bool((out <= 1.0).all())
    print("KERNEL_OK")
</pallas_src>

<mosaic_0001>
module attributes {stable_mosaic.version = 11 : i64} {
  func.func @_fc_kernel(%arg0: i32, %arg1: memref<2x256xf32, #tpu.memory_space<vmem>>, %arg2: memref<256x512xf32, #tpu.memory_space<vmem>>, %arg3: memref<1x512xf32, #tpu.memory_space<vmem>>, %arg4: memref<2x512xf32, #tpu.memory_space<vmem>>) attributes {dimension_semantics = [#tpu.dimension_semantics<arbitrary>], iteration_bounds = array<i64: 1>, scalar_prefetch = 0 : i64, scratch_operands = 0 : i64, tpu.core_type = #tpu.core_type<tc>, window_params = [{pipeline_mode = #tpu.pipeline_mode<synchronous>, transform_indices = @transform_0, window_bounds = array<i64: 2, 256>}, {pipeline_mode = #tpu.pipeline_mode<synchronous>, transform_indices = @transform_1, window_bounds = array<i64: 256, 512>}, {pipeline_mode = #tpu.pipeline_mode<synchronous>, transform_indices = @transform_2, window_bounds = array<i64: 1, 512>}, {pipeline_mode = #tpu.pipeline_mode<synchronous>, transform_indices = @transform_3, window_bounds = array<i64: 2, 512>}]} {
    %c0 = arith.constant 0 : index
    %c0_0 = arith.constant 0 : index
    %0 = vector.load %arg1[%c0, %c0_0] : memref<2x256xf32, #tpu.memory_space<vmem>>, vector<2x256xf32>
    %c0_1 = arith.constant 0 : index
    %c0_2 = arith.constant 0 : index
    %1 = vector.load %arg2[%c0_1, %c0_2] : memref<256x512xf32, #tpu.memory_space<vmem>>, vector<256x512xf32>
    %cst = arith.constant dense<0.000000e+00> : vector<2x512xf32>
    %2 = tpu.matmul %0, %1, %cst {dimension_numbers = #tpu.dot_dimension_numbers<[1], [0], [0], [1], [0, 0, 1, 1], [], []>} : vector<2x256xf32>, vector<256x512xf32>, vector<2x512xf32> -> vector<2x512xf32>
    %c0_3 = arith.constant 0 : index
    %c0_4 = arith.constant 0 : index
    %3 = vector.load %arg3[%c0_3, %c0_4] : memref<1x512xf32, #tpu.memory_space<vmem>>, vector<1x512xf32>
    %4 = vector.broadcast %3 : vector<1x512xf32> to vector<2x512xf32>
    %5 = arith.addf %2, %4 : vector<2x512xf32>
    %cst_5 = arith.constant 0.000000e+00 : f32
    %6 = vector.broadcast %cst_5 : f32 to vector<2x512xf32>
    %7 = arith.cmpf oge, %5, %6 : vector<2x512xf32>
    %cst_6 = arith.constant 2.000000e-01 : f32
    %8 = vector.broadcast %cst_6 : f32 to vector<2x512xf32>
    %9 = arith.mulf %8, %5 : vector<2x512xf32>
    %10 = arith.select %7, %5, %9 : vector<2x512xi1>, vector<2x512xf32>
    %c0_7 = arith.constant 0 : index
    %c0_8 = arith.constant 0 : index
    %11 = vector.load %arg4[%c0_7, %c0_8] : memref<2x512xf32, #tpu.memory_space<vmem>>, vector<2x512xf32>
    tpu.vector_store %arg4[%c0_7, %c0_8], %10 {strides = array<i32>} : memref<2x512xf32, #tpu.memory_space<vmem>>, vector<2x512xf32>,
    return
  }
  func.func @transform_0(%arg0: i32) -> (i32, i32) {
    %c0_i32 = arith.constant 0 : i32
    %c0_i32_0 = arith.constant 0 : i32
    %c0_i32_1 = arith.constant 0 : i32
    return %c0_i32, %c0_i32_0 : i32, i32
  }
  func.func @transform_1(%arg0: i32) -> (i32, i32) {
    %c0_i32 = arith.constant 0 : i32
    %c0_i32_0 = arith.constant 0 : i32
    %c0_i32_1 = arith.constant 0 : i32
    return %c0_i32, %c0_i32_0 : i32, i32
  }
  func.func @transform_2(%arg0: i32) -> (i32, i32) {
    %c0_i32 = arith.constant 0 : i32
    %c0_i32_0 = arith.constant 0 : i32
    %c0_i32_1 = arith.constant 0 : i32
    return %c0_i32, %c0_i32_0 : i32, i32
  }
  func.func @transform_3(%arg0: i32) -> (i32, i32) {
    %c0_i32 = arith.constant 0 : i32
    %c0_i32_0 = arith.constant 0 : i32
    %c0_i32_1 = arith.constant 0 : i32
    return %c0_i32, %c0_i32_0 : i32, i32
  }
}

</mosaic_0001>

<bundles_post_ra>
// kernel: tpu_custom_call.1
= control target key start
LH: loop header
LB: loop body
LE: loop exit
PB: predicated region body
PF: predicated region fallthrough
CT: control target
= control target key end

     0   :  { %8 = vsyncpa [#allocation3], 0  ;;  %s681_s0 = inlined_call_operand.hbm [shape: f32[2,256], index: 0, kind: input, shape index: {}]   ;;  %s682_s1 = inlined_call_operand.hbm [shape: f32[256,512], index: 1, kind: input, shape index: {}]   ;;  %s683_s2 = inlined_call_operand.vmem [shape: f32[1,512], index: 2, kind: input, shape index: {}]   ;;  %s684_s3 = inlined_call_operand.hbm [shape: f32[2,512], index: 3, kind: output, shape index: {}]  }
   0x1   :  { %9 = vsyncpa [#allocation6], 0 }
   0x2   :  { %10 = vsyncpa [#allocation4], 0  ;;  %s603_s12 = smov [#allocation2]   ;;  %s604_s14 = smov [#allocation5]  }
   0x3   :  { %s17_s13 = sshll.u32 %s603_s12, 4  ;;  %s26_s15 = sshll.u32 %s604_s14, 4  ;;  %s18_s13 = int_to_ptr.vmem [resolvable:$true] %s17_s13  ;;  %s629_s15 = int_to_ptr.vmem [resolvable:$true] %s26_s15 }
   0x4   :  { %s531_s18 = scalar_lea.hbm %s681_s0, 64 }
   0x5   :  { %p532_p0 = scmp.ne.s32.totalorder %s681_s0, %s531_s18  ;;  %p535_p1 = scmp.lt.u32.totalorder %s531_s18, %s681_s0 }
   0x7   :  { %p537_p2 = pnand %p535_p1, %p532_p0 }
   0x9   :  { %540 = shalt.err (!%p537_p2)
}
   0xa   :  { %s541_s23 = scalar_lea.vmem %s18_s13, 64  ;;  %p546_p4 = scmp.lt.s32.totalorder %s18_s13, %s18_s13 }
   0xb   :  { %p542_p3 = scmp.ne.s32.totalorder %s18_s13, %s541_s23  ;;  %p547_p5 = scmp.lt.s32.totalorder %s541_s23, %s541_s23 }
   0xd   :  { %p548_p6 = por %p547_p5, %p546_p4 }
   0xf   :  { %p549_p7 = pnand %p548_p6, %p542_p3 }
  0x11   :  { %552 = shalt.err (!%p549_p7)
}
  0x12   :  { %20 = dma.hbm_to_vmem [thread:$0]  %s681_s0, 64, %s18_s13, [#allocation3]  }
  0x13   :  { %s553_s28 = scalar_lea.hbm %s682_s1, 16384 }
  0x14   :  { %p554_p8 = scmp.ne.s32.totalorder %s682_s1, %s553_s28  ;;  %p557_p9 = scmp.lt.u32.totalorder %s553_s28, %s682_s1 }
  0x16   :  { %p559_p10 = pnand %p557_p9, %p554_p8 }
  0x18   :  { %562 = shalt.err (!%p559_p10)
}
  0x19   :  { %s563_s6 = scalar_lea.vmem %s629_s15, 16384  ;;  %p568_p12 = scmp.lt.s32.totalorder %s629_s15, %s629_s15 }
  0x1a   :  { %p564_p11 = scmp.ne.s32.totalorder %s629_s15, %s563_s6  ;;  %p569_p13 = scmp.lt.s32.totalorder %s563_s6, %s563_s6 }
  0x1c   :  { %p570_p0 = por %p569_p13, %p568_p12 }
  0x1e   :  { %p571_p1 = pnand %p570_p0, %p564_p11 }
  0x20   :  { %574 = shalt.err (!%p571_p1)
}
  0x21   :  { %s605_s0 = smov 512   ;;  %s606_s7 = smov 32  }
  0x22   :  { %32 = dma.hbm_to_vmem [thread:$0]  %s682_s1, 16384, %s629_s15, [#allocation6], %s605_s0, %s605_s0, %s606_s7  }
  0x23   :  { %597 = dma.done.wait [#allocation3], 64  }
  0x24   :  { %598 = vsyncadd [#allocation3], 4294967232 }
  0x25   :  { %599 = dma.done.wait [#allocation6], 16384  }
  0x26   :  { %600 = vsyncadd [#allocation6], 4294950912  ;;  %v43_v0 = vld [vmem:[#allocation5 + $0x8] sm:$0xff]  ;;  %v45_v2 = vld [vmem:[#allocation5 + $0x18] sm:$0xff] }
  0x27   :  { %v47_v1 = vld [vmem:[#allocation5 + $0x28] sm:$0xff]  ;;  %v49_v4 = vld [vmem:[#allocation5 + $0x38] sm:$0xff]  ;;  %v42_v5 = vld [vmem:[#allocation5] sm:$0xff] }
  0x28   :  { %v397_v3 = vpack.c.bf16 %v47_v1, %v43_v0  ;;  %v46_v6 = vld [vmem:[#allocation5 + $0x20] sm:$0xff]  ;;  %v461_v7 = vpack.c.bf16 %v49_v4, %v45_v2  ;;  %v44_v9 = vld [vmem:[#allocation5 + $0x10] sm:$0xff]  ;;  %v51_v11 = vld [vmem:[#allocation5 + $0x48] sm:$0xff] }
  0x29   :  { %v399_v8 = vpack.c.bf16 %v46_v6, %v42_v5  ;;  %v48_v10 = vld [vmem:[#allocation5 + $0x30] sm:$0xff]  ;;  %v55_v13 = vld [vmem:[#allocation5 + $0x68] sm:$0xff]  ;;  %v53_v14 = vld [vmem:[#allocation5 + $0x58] sm:$0xff] }
  0x2a   :  { %398 = vmatprep.subr.bf16.mxu0 %v397_v3  ;;  %v463_v12 = vpack.c.bf16 %v48_v10, %v44_v9  ;;  %v57_v15 = vld [vmem:[#allocation5 + $0x78] sm:$0xff]  ;;  %462 = vmatprep.subr.bf16.mxu1 %v461_v7  ;;  %v401_v16 = vpack.c.bf16 %v55_v13, %v51_v11  ;;  %v50_v18 = vld [vmem:[#allocation5 + $0x40] sm:$0xff]  ;;  %v52_v20 = vld [vmem:[#allocation5 + $0x50] sm:$0xff] }
  0x2b   :  { %400 = vmatpush1.bf16.msra.mxu0 %v399_v8  ;;  %v465_v17 = vpack.c.bf16 %v57_v15, %v53_v14  ;;  %v54_v19 = vld [vmem:[#allocation5 + $0x60] sm:$0xff]  ;;  %v56_v22 = vld [vmem:[#allocation5 + $0x70] sm:$0xff]  ;;  %v59_v23 = vld [vmem:[#allocation5 + $0x88] sm:$0xff] }
  0x2c   :  { %464 = vmatpush1.bf16.msra.mxu1 %v463_v12  ;;  %v403_v21 = vpack.c.bf16 %v54_v19, %v50_v18  ;;  %v63_v24 = vld [vmem:[#allocation5 + $0xa8] sm:$0xff]  ;;  %402 = vmatprep.subr.bf16.mxu0 %v401_v16  ;;  %v467_v25 = vpack.c.bf16 %v56_v22, %v52_v20  ;;  %v61_v27 = vld [vmem:[#allocation5 + $0x98] sm:$0xff]  ;;  %v58_v29 = vld [vmem:[#allocation5 + $0x80] sm:$0xff] }
  0x2d   :  { %466 = vmatprep.subr.bf16.mxu1 %v465_v17  ;;  %v405_v26 = vpack.c.bf16 %v63_v24, %v59_v23  ;;  %v65_v28 = vld [vmem:[#allocation5 + $0xb8] sm:$0xff]  ;;  %v62_v31 = vld [vmem:[#allocation5 + $0xa0] sm:$0xff]  ;;  %v60_v32 = vld [vmem:[#allocation5 + $0x90] sm:$0xff] }
  0x2e   :  { %v469_v30 = vpack.c.bf16 %v65_v28, %v61_v27  ;;  %v64_v33 = vld [vmem:[#allocation5 + $0xb0] sm:$0xff]  ;;  %v407_v34 = vpack.c.bf16 %v62_v31, %v58_v29  ;;  %v67_v35 = vld [vmem:[#allocation5 + $0xc8] sm:$0xff]  ;;  %v69_v37 = vld [vmem:[#allocation5 + $0xd8] sm:$0xff] }
  0x2f   :  { %404 = vmatpush1.bf16.msra.mxu0 %v403_v21  ;;  %v71_v36 = vld [vmem:[#allocation5 + $0xe8] sm:$0xff]  ;;  %v471_v38 = vpack.c.bf16 %v64_v33, %v60_v32  ;;  %v73_v40 = vld [vmem:[#allocation5 + $0xf8] sm:$0xff]  ;;  %v66_v41 = vld [vmem:[#allocation5 + $0xc0] sm:$0xff] }
  0x30   :  { %468 = vmatpush1.bf16.msra.mxu1 %v467_v25  ;;  %406 = vmatprep.subr.bf16.mxu0 %v405_v26  ;;  %v409_v39 = vpack.c.bf16 %v71_v36, %v67_v35  ;;  %v70_v42 = vld [vmem:[#allocation5 + $0xe0] sm:$0xff]  ;;  %v473_v43 = vpack.c.bf16 %v73_v40, %v69_v37  ;;  %v68_v44 = vld [vmem:[#allocation5 + $0xd0] sm:$0xff]  ;;  %v75_v46 = vld [vmem:[#allocation5 + $0x108] sm:$0xff] }
  0x31   :  { %470 = vmatprep.subr.bf16.mxu1 %v469_v30  ;;  %v72_v45 = vld [vmem:[#allocation5 + $0xf0] sm:$0xff]  ;;  %v79_v47 = vld [vmem:[#allocation5 + $0x128] sm:$0xff]  ;;  %v77_v48 = vld [vmem:[#allocation5 + $0x118] sm:$0xff]  ;;  %v411_v50 = vpack.c.bf16 %v70_v42, %v66_v41 }
  0x32   :  { %v81_v49 = vld [vmem:[#allocation5 + $0x138] sm:$0xff]  ;;  %v475_v51 = vpack.c.bf16 %v72_v45, %v68_v44  ;;  %v413_v52 = vpack.c.bf16 %v79_v47, %v75_v46  ;;  %v74_v53 = vld [vmem:[#allocation5 + $0x100] sm:$0xff]  ;;  %v76_v55 = vld [vmem:[#allocation5 + $0x110] sm:$0xff] }
  0x33   :  { %408 = vmatpush1.bf16.msra.mxu0 %v407_v34  ;;  %v78_v54 = vld [vmem:[#allocation5 + $0x120] sm:$0xff]  ;;  %v477_v56 = vpack.c.bf16 %v81_v49, %v77_v48  ;;  %v80_v57 = vld [vmem:[#allocation5 + $0x130] sm:$0xff]  ;;  %v83_v58 = vld [vmem:[#allocation5 + $0x148] sm:$0xff] }
  0x34   :  { %472 = vmatpush1.bf16.msra.mxu1 %v471_v38  ;;  %410 = vmatprep.subr.bf16.mxu0 %v409_v39  ;;  %v87_v59 = vld [vmem:[#allocation5 + $0x168] sm:$0xff]  ;;  %v85_v60 = vld [vmem:[#allocation5 + $0x158] sm:$0xff]  ;;  %v415_v62 = vpack.c.bf16 %v78_v54, %v74_v53  ;;  %v479_v63 = vpack.c.bf16 %v80_v57, %v76_v55  ;;  %v82_v1 = vld [vmem:[#allocation5 + $0x140] sm:$0xff] }
  0x35   :  { %474 = vmatprep.subr.bf16.mxu1 %v473_v43  ;;  %v89_v61 = vld [vmem:[#allocation5 + $0x178] sm:$0xff]  ;;  %v417_v0 = vpack.c.bf16 %v87_v59, %v83_v58  ;;  %v86_v2 = vld [vmem:[#allocation5 + $0x160] sm:$0xff]  ;;  %v84_v3 = vld [vmem:[#allocation5 + $0x150] sm:$0xff] }
  0x36   :  { %v481_v4 = vpack.c.bf16 %v89_v61, %v85_v60  ;;  %v88_v5 = vld [vmem:[#allocation5 + $0x170] sm:$0xff]  ;;  %v91_v6 = vld [vmem:[#allocation5 + $0x188] sm:$0xff]  ;;  %v93_v8 = vld [vmem:[#allocation5 + $0x198] sm:$0xff]  ;;  %v419_v10 = vpack.c.bf16 %v86_v2, %v82_v1 }
  0x37   :  { %412 = vmatpush1.bf16.msra.mxu0 %v411_v50  ;;  %v95_v7 = vld [vmem:[#allocation5 + $0x1a8] sm:$0xff]  ;;  %v97_v9 = vld [vmem:[#allocation5 + $0x1b8] sm:$0xff]  ;;  %v483_v11 = vpack.c.bf16 %v88_v5, %v84_v3  ;;  %v90_v13 = vld [vmem:[#allocation5 + $0x180] sm:$0xff] }
  0x38   :  { %476 = vmatpush1.bf16.msra.mxu1 %v475_v51  ;;  %414 = vmatprep.subr.bf16.mxu0 %v413_v52  ;;  %v421_v12 = vpack.c.bf16 %v95_v7, %v91_v6  ;;  %v94_v14 = vld [vmem:[#allocation5 + $0x1a0] sm:$0xff]  ;;  %v92_v15 = vld [vmem:[#allocation5 + $0x190] sm:$0xff]  ;;  %v485_v16 = vpack.c.bf16 %v97_v9, %v93_v8  ;;  %v99_v18 = vld [vmem:[#allocation5 + $0x1c8] sm:$0xff] }
  0x39   :  { %478 = vmatprep.subr.bf16.mxu1 %v477_v56  ;;  %v96_v17 = vld [vmem:[#allocation5 + $0x1b0] sm:$0xff]  ;;  %v103_v19 = vld [vmem:[#allocation5 + $0x1e8] sm:$0xff]  ;;  %v101_v20 = vld [vmem:[#allocation5 + $0x1d8] sm:$0xff]  ;;  %v423_v22 = vpack.c.bf16 %v94_v14, %v90_v13 }
  0x3a   :  { %v105_v21 = vld [vmem:[#allocation5 + $0x1f8] sm:$0xff]  ;;  %v487_v23 = vpack.c.bf16 %v96_v17, %v92_v15  ;;  %v425_v24 = vpack.c.bf16 %v103_v19, %v99_v18  ;;  %v98_v25 = vld [vmem:[#allocation5 + $0x1c0] sm:$0xff]  ;;  %v100_v27 = vld [vmem:[#allocation5 + $0x1d0] sm:$0xff] }
  0x3b   :  { %416 = vmatpush1.bf16.msra.mxu0 %v415_v62  ;;  %v102_v26 = vld [vmem:[#allocation5 + $0x1e0] sm:$0xff]  ;;  %v489_v28 = vpack.c.bf16 %v105_v21, %v101_v20  ;;  %v104_v29 = vld [vmem:[#allocation5 + $0x1f0] sm:$0xff]  ;;  %v107_v30 = vld [vmem:[#allocation5 + $0x208] sm:$0xff] }
  0x3c   :  { %480 = vmatpush1.bf16.msra.mxu1 %v479_v63  ;;  %418 = vmatprep.subr.bf16.mxu0 %v417_v0  ;;  %v111_v31 = vld [vmem:[#allocation5 + $0x228] sm:$0xff]  ;;  %v109_v32 = vld [vmem:[#allocation5 + $0x218] sm:$0xff]  ;;  %v427_v34 = vpack.c.bf16 %v102_v26, %v98_v25  ;;  %v491_v35 = vpack.c.bf16 %v104_v29, %v100_v27  ;;  %v106_v37 = vld [vmem:[#allocation5 + $0x200] sm:$0xff] }
  0x3d   :  { %482 = vmatprep.subr.bf16.mxu1 %v481_v4  ;;  %v113_v33 = vld [vmem:[#allocation5 + $0x238] sm:$0xff]  ;;  %v429_v36 = vpack.c.bf16 %v111_v31, %v107_v30  ;;  %v110_v38 = vld [vmem:[#allocation5 + $0x220] sm:$0xff]  ;;  %v108_v39 = vld [vmem:[#allocation5 + $0x210] sm:$0xff] }
  0x3e   :  { %v493_v40 = vpack.c.bf16 %v113_v33, %v109_v32  ;;  %v112_v41 = vld [vmem:[#allocation5 + $0x230] sm:$0xff]  ;;  %v115_v42 = vld [vmem:[#allocation5 + $0x248] sm:$0xff]  ;;  %v117_v44 = vld [vmem:[#allocation5 + $0x258] sm:$0xff]  ;;  %v431_v46 = vpack.c.bf16 %v110_v38, %v106_v37 }
  0x3f   :  { %420 = vmatpush1.bf16.msra.mxu0 %v419_v10  ;;  %v119_v43 = vld [vmem:[#allocation5 + $0x268] sm:$0xff]  ;;  %v121_v45 = vld [vmem:[#allocation5 + $0x278] sm:$0xff]  ;;  %v495_v47 = vpack.c.bf16 %v112_v41, %v108_v39  ;;  %v114_v49 = vld [vmem:[#allocation5 + $0x240] sm:$0xff] }
  0x40   :  { %484 = vmatpush1.bf16.msra.mxu1 %v483_v11  ;;  %422 = vmatprep.subr.bf16.mxu0 %v421_v12  ;;  %v433_v48 = vpack.c.bf16 %v119_v43, %v115_v42  ;;  %v118_v50 = vld [vmem:[#allocation5 + $0x260] sm:$0xff]  ;;  %v116_v51 = vld [vmem:[#allocation5 + $0x250] sm:$0xff]  ;;  %v497_v52 = vpack.c.bf16 %v121_v45, %v117_v44  ;;  %v123_v54 = vld [vmem:[#allocation5 + $0x288] sm:$0xff] }
  0x41   :  { %486 = vmatprep.subr.bf16.mxu1 %v485_v16  ;;  %v120_v53 = vld [vmem:[#allocation5 + $0x270] sm:$0xff]  ;;  %v127_v55 = vld [vmem:[#allocation5 + $0x2a8] sm:$0xff]  ;;  %v125_v56 = vld [vmem:[#allocation5 + $0x298] sm:$0xff]  ;;  %v435_v58 = vpack.c.bf16 %v118_v50, %v114_v49 }
  0x42   :  { %v129_v57 = vld [vmem:[#allocation5 + $0x2b8] sm:$0xff]  ;;  %v499_v59 = vpack.c.bf16 %v120_v53, %v116_v51  ;;  %v437_v60 = vpack.c.bf16 %v127_v55, %v123_v54  ;;  %v122_v61 = vld [vmem:[#allocation5 + $0x280] sm:$0xff]  ;;  %v124_v63 = vld [vmem:[#allocation5 + $0x290] sm:$0xff] }
  0x43   :  { %424 = vmatpush1.bf16.msra.mxu0 %v423_v22  ;;  %v126_v62 = vld [vmem:[#allocation5 + $0x2a0] sm:$0xff]  ;;  %v501_v0 = vpack.c.bf16 %v129_v57, %v125_v56  ;;  %v128_v1 = vld [vmem:[#allocation5 + $0x2b0] sm:$0xff]  ;;  %v131_v2 = vld [vmem:[#allocation5 + $0x2c8] sm:$0xff] }
  0x44   :  { %488 = vmatpush1.bf16.msra.mxu1 %v487_v23  ;;  %426 = vmatprep.subr.bf16.mxu0 %v425_v24  ;;  %v135_v3 = vld [vmem:[#allocation5 + $0x2e8] sm:$0xff]  ;;  %v133_v4 = vld [vmem:[#allocation5 + $0x2d8] sm:$0xff]  ;;  %v439_v6 = vpack.c.bf16 %v126_v62, %v122_v61  ;;  %v130_v7 = vld [vmem:[#allocation5 + $0x2c0] sm:$0xff]  ;;  %v503_v8 = vpack.c.bf16 %v128_v1, %v124_v63 }
  0x45   :  { %490 = vmatprep.subr.bf16.mxu1 %v489_v28  ;;  %v137_v5 = vld [vmem:[#allocation5 + $0x2f8] sm:$0xff]  ;;  %v441_v9 = vpack.c.bf16 %v135_v3, %v131_v2  ;;  %v134_v10 = vld [vmem:[#allocation5 + $0x2e0] sm:$0xff]  ;;  %v132_v11 = vld [vmem:[#allocation5 + $0x2d0] sm:$0xff]  ;;  %v172_v2 = vlaneseq }
  0x46   :  { %v136_v12 = vld [vmem:[#allocation5 + $0x2f0] sm:$0xff]  ;;  %v505_v13 = vpack.c.bf16 %v137_v5, %v133_v4  ;;  %v139_v14 = vld [vmem:[#allocation5 + $0x308] sm:$0xff]  ;;  %v660_v16 = vld.sshfl [vmem:[#allocation2] sm:$0x33 pattern:$0x76325410]  ;;  %v443_v20 = vpack.c.bf16 %v134_v10, %v130_v7 }
  0x47   :  { %428 = vmatpush1.bf16.msra.mxu0 %v427_v34  ;;  %v143_v15 = vld [vmem:[#allocation5 + $0x328] sm:$0xff]  ;;  %v141_v17 = vld [vmem:[#allocation5 + $0x318] sm:$0xff]  ;;  %v200_v19 = vcombine.high %v660_v16, %v660_v16  ;;  %v507_v21 = vpack.c.bf16 %v136_v12, %v132_v11  ;;  %v138_v23 = vld [vmem:[#allocation5 + $0x300] sm:$0xff]  ;;  %v173_v3 = vshrl.u32 %v172_v2, 7  ;;  %v607_v10 = vmov 1983009808  }
  0x48   :  { %492 = vmatpush1.bf16.msra.mxu1 %v491_v35  ;;  %430 = vmatprep.subr.bf16.mxu0 %v429_v36  ;;  %v145_v18 = vld [vmem:[#allocation5 + $0x338] sm:$0xff]  ;;  %v445_v22 = vpack.c.bf16 %v143_v15, %v139_v14  ;;  %v142_v24 = vld [vmem:[#allocation5 + $0x320] sm:$0xff]  ;;  %v140_v25 = vld [vmem:[#allocation5 + $0x310] sm:$0xff]  ;;  %v364_v11 = vunpack.c.l.s4 %v607_v10 }
  0x49   :  { %494 = vmatprep.subr.bf16.mxu1 %v493_v40  ;;  %v509_v26 = vpack.c.bf16 %v145_v18, %v141_v17  ;;  %v144_v27 = vld [vmem:[#allocation5 + $0x330] sm:$0xff]  ;;  %v147_v28 = vld [vmem:[#allocation5 + $0x348] sm:$0xff]  ;;  %267 = vmatprep.mubr.f32.mxu0 %v200_v19  ;;  %v149_v30 = vld [vmem:[#allocation5 + $0x358] sm:$0xff]  ;;  %v447_v32 = vpack.c.bf16 %v142_v24, %v138_v23  ;;  %v174_v4 = vsub.s32 0, %v173_v3  ;;  %v178_v7 = vsub.s32 1, %v173_v3 }
  0x4a   :  { %v151_v29 = vld [vmem:[#allocation5 + $0x368] sm:$0xff]  ;;  %v153_v31 = vld [vmem:[#allocation5 + $0x378] sm:$0xff]  ;;  %338 = vmatprep.mubr.f32.mxu1 %v200_v19  ;;  %v511_v33 = vpack.c.bf16 %v144_v27, %v140_v25  ;;  %v146_v35 = vld [vmem:[#allocation5 + $0x340] sm:$0xff]  ;;  %v365_v19 = vunpack.c.0.s8 %v364_v11 }
  0x4b   :  { %432 = vmatpush1.bf16.msra.mxu0 %v431_v46  ;;  %v449_v34 = vpack.c.bf16 %v151_v29, %v147_v28  ;;  %v150_v36 = vld [vmem:[#allocation5 + $0x360] sm:$0xff]  ;;  %v148_v37 = vld [vmem:[#allocation5 + $0x350] sm:$0xff]  ;;  %v513_v38 = vpack.c.bf16 %v153_v31, %v149_v30  ;;  %v155_v40 = vld [vmem:[#allocation5 + $0x388] sm:$0xff] }
  0x4c   :  { %496 = vmatpush1.bf16.msra.mxu1 %v495_v47  ;;  %434 = vmatprep.subr.bf16.mxu0 %v433_v48  ;;  %v152_v39 = vld [vmem:[#allocation5 + $0x370] sm:$0xff]  ;;  %v159_v41 = vld [vmem:[#allocation5 + $0x3a8] sm:$0xff]  ;;  %v157_v42 = vld [vmem:[#allocation5 + $0x398] sm:$0xff]  ;;  %v451_v44 = vpack.c.bf16 %v150_v36, %v146_v35  ;;  %v368_v29 = vsub.s32 %v365_v19, %v173_v3 }
  0x4d   :  { %498 = vmatprep.subr.bf16.mxu1 %v497_v52  ;;  %v161_v43 = vld [vmem:[#allocation5 + $0x3b8] sm:$0xff]  ;;  %v515_v45 = vpack.c.bf16 %v152_v39, %v148_v37  ;;  %v453_v46 = vpack.c.bf16 %v159_v41, %v155_v40  ;;  %v154_v47 = vld [vmem:[#allocation5 + $0x380] sm:$0xff]  ;;  %v156_v49 = vld [vmem:[#allocation5 + $0x390] sm:$0xff] }
  0x4e   :  { %v158_v48 = vld [vmem:[#allocation5 + $0x3a0] sm:$0xff]  ;;  %v517_v50 = vpack.c.bf16 %v161_v43, %v157_v42  ;;  %v160_v51 = vld [vmem:[#allocation5 + $0x3b0] sm:$0xff]  ;;  %v163_v52 = vld [vmem:[#allocation5 + $0x3c8] sm:$0xff] }
  0x4f   :  { %436 = vmatpush1.bf16.msra.mxu0 %v435_v58  ;;  %v167_v53 = vld [vmem:[#allocation5 + $0x3e8] sm:$0xff]  ;;  %v165_v54 = vld [vmem:[#allocation5 + $0x3d8] sm:$0xff]  ;;  %v455_v56 = vpack.c.bf16 %v158_v48, %v154_v47  ;;  %v519_v57 = vpack.c.bf16 %v160_v51, %v156_v49  ;;  %v164_v62 = vld [vmem:[#allocation5 + $0x3d0] sm:$0xff] }
  0x50   :  { %500 = vmatpush1.bf16.msra.mxu1 %v499_v59  ;;  %438 = vmatprep.subr.bf16.mxu0 %v437_v60  ;;  %v169_v55 = vld [vmem:[#allocation5 + $0x3f8] sm:$0xff]  ;;  %v457_v58 = vpack.c.bf16 %v167_v53, %v163_v52  ;;  %v162_v59 = vld [vmem:[#allocation5 + $0x3c0] sm:$0xff]  ;;  %v168_v63 = vld [vmem:[#allocation5 + $0x3f0] sm:$0xff] }
  0x51   :  { %502 = vmatprep.subr.bf16.mxu1 %v501_v0  ;;  %v166_v60 = vld [vmem:[#allocation5 + $0x3e0] sm:$0xff]  ;;  %v521_v61 = vpack.c.bf16 %v169_v55, %v165_v54  ;;  %v523_v1 = vpack.c.bf16 %v168_v63, %v164_v62  ;;  %v170_v5 = vld [vmem:[%s683_s2] sm:$0xf]  ;;  %s608_s2 = smov [#allocation7]  }
  0x52   :  { %v459_v0 = vpack.c.bf16 %v166_v60, %v162_v59  ;;  %s386_s11 = sshll.u32 %s608_s2, 4  ;;  %s387_s11 = int_to_ptr.vmem [resolvable:$true] %s386_s11 }
  0x53   :  { %440 = vmatpush1.bf16.msra.mxu0 %v439_v6  ;;  %v182_v6 = vsub.s32 2, %v173_v3  ;;  %s575_s12 = scalar_lea.vmem %s387_s11, 128  ;;  %p580_p3 = scmp.lt.s32.totalorder %s387_s11, %s387_s11 }
  0x54   :  { %504 = vmatpush1.bf16.msra.mxu1 %v503_v8  ;;  %442 = vmatprep.subr.bf16.mxu0 %v441_v9  ;;  %v186_v8 = vsub.s32 3, %v173_v3  ;;  %v175_v9 = vrot.slane %v170_v5, %v174_v4  ;;  %p576_p2 = scmp.ne.s32.totalorder %s387_s11, %s575_s12  ;;  %p581_p4 = scmp.lt.s32.totalorder %s575_s12, %s575_s12 }
  0x55   :  { %506 = vmatprep.subr.bf16.mxu1 %v505_v13  ;;  %v183_v12 = vrot.slane %v170_v5, %v182_v6  ;;  %v179_v13 = vrot.slane %v170_v5, %v178_v7 }
  0x56   :  { %v187_v14 = vrot.slane %v170_v5, %v186_v8  ;;  %p582_p5 = por %p581_p4, %p580_p3 }
  0x57   :  { %444 = vmatpush1.bf16.msra.mxu0 %v443_v20 }
  0x58   :  { %508 = vmatpush1.bf16.msra.mxu1 %v507_v21  ;;  %446 = vmatprep.subr.bf16.mxu0 %v445_v22  ;;  %p583_p6 = pnand %p582_p5, %p576_p2 }
  0x59   :  { %510 = vmatprep.subr.bf16.mxu1 %v509_v26 }
  0x5b   :  { %448 = vmatpush1.bf16.msra.mxu0 %v447_v32 }
  0x5c   :  { %512 = vmatpush1.bf16.msra.mxu1 %v511_v33  ;;  %450 = vmatprep.subr.bf16.mxu0 %v449_v34 }
  0x5d   :  { %514 = vmatprep.subr.bf16.mxu1 %v513_v38 }
  0x5f   :  { %452 = vmatpush1.bf16.msra.mxu0 %v451_v44 }
  0x60   :  { %516 = vmatpush1.bf16.msra.mxu1 %v515_v45  ;;  %454 = vmatprep.subr.bf16.mxu0 %v453_v46 }
  0x61   :  { %518 = vmatprep.subr.bf16.mxu1 %v517_v50 }
  0x63   :  { %456 = vmatpush1.bf16.msra.mxu0 %v455_v56 }
  0x64   :  { %520 = vmatpush1.bf16.msra.mxu1 %v519_v57  ;;  %458 = vmatprep.subr.bf16.mxu0 %v457_v58 }
  0x65   :  { %522 = vmatprep.subr.bf16.mxu1 %v521_v61 }
  0x67   :  { %460 = vmatpush1.bf16.msra.mxu0 %v459_v0 }
  0x68   :  { %524 = vmatpush1.bf16.msra.mxu1 %v523_v1 }
  0x6a   :  { %268 = vmatmul.mubr.f32.vlgmr.msra.gmra.mrb[0].mxu0 %v660_v16 }
  0x6b   :  { %339 = vmatmul.mubr.f32.vlgmr.msra.gmra.mrb[0].mxu1 %v660_v16 }
 0x13d   :  { %v269_v15 = vpop.f32.mrb[0].mxu0 }
 0x13e   :  { %v270_v17 = vadd.f32 %v269_v15, %v175_v9  ;;  %v340_v18 = vpop.f32.mrb[0].mxu1  ;;  %v271_v16 = vpop.f32.mrb[1].mxu0 }
 0x13f   :  { %v341_v20 = vadd.f32 %v340_v18, %v183_v12  ;;  %v272_v21 = vadd.f32 %v271_v16, %v179_v13  ;;  %v342_v22 = vpop.f32.mrb[1].mxu1 }
 0x140   :  { %vm345_vm0 = vcmp.ge.f32.partialorder %v270_v17, 0.0  ;;  %v349_v23 = vmul.f32 0.2, %v270_v17  ;;  %v343_v24 = vadd.f32 %v342_v22, %v187_v14 }
 0x141   :  { %vm347_vm1 = vcmp.ge.f32.partialorder %v341_v20, 0.0  ;;  %v351_v25 = vmul.f32 0.2, %v341_v20  ;;  %vm346_vm2 = vcmp.ge.f32.partialorder %v272_v21, 0.0  ;;  %v350_v26 = vmul.f32 0.2, %v272_v21 }
 0x142   :  { %v353_v27 = vsel %vm345_vm0, %v270_v17, %v349_v23  ;;  %vm348_vm3 = vcmp.ge.f32.partialorder %v343_v24, 0.0  ;;  %v352_v28 = vmul.f32 0.2, %v343_v24 }
 0x143   :  { %v355_v30 = vsel %vm347_vm1, %v341_v20, %v351_v25  ;;  %v354_v31 = vsel %vm346_vm2, %v272_v21, %v350_v26 }
 0x144   :  { %v361_v32 = vcombine.low %v353_v27, %v354_v31  ;;  %v356_v33 = vsel %vm348_vm3, %v343_v24, %v352_v28 }
 0x145   :  { %v362_v34 = vcombine.low %v355_v30, %v356_v33 }
 0x146   :  { %v369_v35 = vrot.slane %v361_v32, %v368_v29 }
 0x147   :  { %v376_v36 = vrot.slane %v362_v34, %v368_v29 }
 0x149   :  { %v377_v37 = vcombine.low %v369_v35, %v376_v36 }
 0x14b   :  { %379 = vst [vmem:[#allocation7] sm:$0xff] %v377_v37 }
 0x14c   :  { %586 = shalt.err (!%p583_p6)
}
 0x14d   :  { %s587_s15 = scalar_lea.hbm %s684_s3, 128 }
 0x14e   :  { %p588_p7 = scmp.ne.s32.totalorder %s684_s3, %s587_s15  ;;  %p591_p8 = scmp.lt.u32.totalorder %s587_s15, %s684_s3 }
 0x150   :  { %p593_p9 = pnand %p591_p8, %p588_p7 }
 0x152   :  { %596 = shalt.err (!%p593_p9)
}
 0x153   :  { %389 = dma.vmem_to_hbm [thread:$0]  %s387_s11, 128, %s684_s3, [#allocation4]  }
 0x154   :  { %601 = dma.done.wait [#allocation4], 128  }
 0x155   :  { %602 = vsyncadd [#allocation4], 4294967168 }
 0x156   :  { %393 = vsyncpa [#allocation3], 1 }
 0x157   :  { %394 = vsyncpa [#allocation6], 1 }
 0x158   :  { %395 = vsyncpa [#allocation4], 1 }

</bundles_post_ra>
